<compile_context>
chip_gen: v7x
topology: tpu7x:2x2x1
jax: 0.10.0
libtpu: 0.0.40
codegen_flags: <defaults>
</compile_context>

<pallas_src>
import jax
import jax.numpy as jnp
from jax.experimental import pallas as pl
from jax.experimental.pallas import tpu as pltpu


def _round_up(x, m):
    return ((x + m - 1) // m) * m


# ---------------------------------------------------------------------------
# Kernels
# ---------------------------------------------------------------------------
def ffn_resident_kernel(x_ref, w1_ref, b1_ref, w2_ref, b2_ref, mas_ref, o_ref):
    """Whole FFN for one row tile; W1/W2 fully VMEM-resident, no scratch."""
    # h = relu(x @ W1 + b1), f32 accumulation on the MXU.
    h = jnp.dot(x_ref[...], w1_ref[...], preferred_element_type=jnp.float32)
    h = jnp.maximum(h + b1_ref[...], 0.0)
    # TODO(synk): dropout with drop_p=0.0 is the identity, so it is omitted.
    y = jnp.dot(h.astype(w2_ref.dtype), w2_ref[...],
                preferred_element_type=jnp.float32)
    o_ref[...] = ((y + b2_ref[...]) * mas_ref[...]).astype(o_ref.dtype)


def ffn_ktiled_kernel(x_ref, w1_ref, b1_ref, w2_ref, b2_ref, mas_ref, o_ref,
                      acc_ref):
    """Fallback for huge hidden dims: reduce over hidden tiles k.

    The reduction axis k is the LAST grid axis; the k==0 init / k==last
    finalize pattern below silently breaks if the grid is reordered.
    """
    k = pl.program_id(1)

    @pl.when(k == 0)
    def _():
        acc_ref[...] = jnp.zeros_like(acc_ref)

    h = jnp.dot(x_ref[...], w1_ref[...], preferred_element_type=jnp.float32)
    h = jnp.maximum(h + b1_ref[...], 0.0)
    # TODO(synk): dropout with drop_p=0.0 is the identity, so it is omitted.
    acc_ref[...] += jnp.dot(h.astype(w2_ref.dtype), w2_ref[...],
                            preferred_element_type=jnp.float32)

    @pl.when(k == pl.num_programs(1) - 1)
    def _():
        o_ref[...] = ((acc_ref[...] + b2_ref[...])
                      * mas_ref[...]).astype(o_ref.dtype)


# ---------------------------------------------------------------------------
# Wrapper
# ---------------------------------------------------------------------------
_TM_CANDIDATES = (1024, 768, 512, 384, 256, 128, 64, 32, 16, 8)


def _pick_tm(M, sub, per_row_bytes, fixed_bytes, budget):
    """Largest row tile (multiple of `sub`, <= padded M) fitting the budget."""
    tm_max = _round_up(max(M, 1), sub)
    cands = sorted({t for t in _TM_CANDIDATES if t % sub == 0} | {tm_max, sub},
                   reverse=True)
    for tm in cands:
        if tm <= tm_max and fixed_bytes + tm * per_row_bytes <= budget:
            return tm
    return sub


def ffn_pallas(x, mas, w1, b1, w2, b2, *, compute_dtype=None,
               vmem_limit_bytes=48 * 1024 * 1024,
               vmem_budget_bytes=40 * 1024 * 1024):
    """x: (B, S, d_model), mas: (B, S, 1).  Weights stored (in, out) = torch W.T.

    Returns (B, S, d_model) in x.dtype.  `compute_dtype` (e.g. jnp.bfloat16)
    sets the MXU input dtype; accumulation is always f32.
    """
    B, S, d_model = x.shape
    d_hid = w1.shape[1]
    M = B * S
    out_dtype = x.dtype
    cdt = jnp.dtype(compute_dtype) if compute_dtype is not None else jnp.dtype(x.dtype)
    csz = cdt.itemsize
    osz = jnp.dtype(out_dtype).itemsize
    sub = max(8, 32 // csz)               # sublane alignment for compute dtype

    dP = _round_up(d_model, 128)          # lane-dense feature dim
    hP = _round_up(d_hid, 128)            # hidden dim

    # ---- choose weight-resident vs. k-tiled layout --------------------------
    bias_vmem = 2 * 4 * (8 * hP + 8 * dP)                  # f32, sublane padded
    w_resident_vmem = 2 * 2 * dP * hP * csz                # W1+W2, double-buffered
    per_row_resident = 2 * dP * csz + 2 * dP * osz + 2 * 128 * csz  # x, out, mas
    resident = (w_resident_vmem + bias_vmem + sub * per_row_resident
                <= vmem_budget_bytes)

    if resident:
        tk = hP
        per_row = per_row_resident
        fixed = w_resident_vmem + bias_vmem
    else:
        tk = 128
        for cand in (512, 256, 128):      # v7x-aware: shrink tk before tm
            if (2 * 2 * dP * cand * csz + bias_vmem
                    + 64 * (2 * dP * (csz + osz) + 2 * 128 * csz + 4 * dP)
                    <= vmem_budget_bytes):
                tk = cand
                break
        tk = min(tk, hP)
        hP = _round_up(hP, tk)
        per_row = 2 * dP * (csz + osz) + 2 * 128 * csz + 4 * dP  # + f32 acc
        fixed = 2 * 2 * dP * tk * csz + bias_vmem

    tm = _pick_tm(M, sub, per_row, fixed, vmem_budget_bytes)
    Mp = _round_up(M, tm)
    # v7x megacore: give the "parallel" row axis at least 2 tiles when possible.
    if Mp // tm < 2:
        tm_half = _round_up((M + 1) // 2, sub)
        if tm_half < tm:
            tm = tm_half
            Mp = _round_up(M, tm)
    n_row_tiles = Mp // tm

    # ---- pad / cast operands (static checks: no-ops when already aligned) ---
    x2 = x.reshape(M, d_model).astype(cdt)
    if (Mp, dP) != (M, d_model):
        x2 = jnp.zeros((Mp, dP), cdt).at[:M, :d_model].set(x2)

    m2 = mas.reshape(M, 1).astype(cdt)
    if Mp != M:
        m2 = jnp.zeros((Mp, 1), cdt).at[:M, :].set(m2)

    w1p = w1.astype(cdt)
    if (dP, hP) != (d_model, d_hid):
        w1p = jnp.zeros((dP, hP), cdt).at[:d_model, :d_hid].set(w1p)
    w2p = w2.astype(cdt)
    if (hP, dP) != (d_hid, d_model):
        w2p = jnp.zeros((hP, dP), cdt).at[:d_hid, :d_model].set(w2p)

    b1p = b1.reshape(1, -1).astype(jnp.float32)
    if hP != d_hid:
        b1p = jnp.zeros((1, hP), jnp.float32).at[:, :d_hid].set(b1p)
    b2p = b2.reshape(1, -1).astype(jnp.float32)
    if dP != d_model:
        b2p = jnp.zeros((1, dP), jnp.float32).at[:, :d_model].set(b2p)

    # ---- cost estimate reflecting actual HBM traffic ------------------------
    restream = 1 if resident else n_row_tiles
    flops = 2 * 2 * Mp * dP * hP
    bytes_accessed = (x2.size * csz + m2.size * csz
                      + restream * (w1p.size + w2p.size) * csz
                      + (b1p.size + b2p.size) * 4
                      + Mp * dP * osz)
    cost = pl.CostEstimate(flops=flops, transcendentals=0,
                           bytes_accessed=bytes_accessed)
    cparams = pltpu.CompilerParams(
        dimension_semantics=("parallel",) if resident else ("parallel", "arbitrary"),
        vmem_limit_bytes=vmem_limit_bytes)

    if resident:
        out = pl.pallas_call(
            ffn_resident_kernel,
            out_shape=jax.ShapeDtypeStruct((Mp, dP), out_dtype),
            grid_spec=pltpu.PrefetchScalarGridSpec(
                num_scalar_prefetch=0,
                grid=(n_row_tiles,),
                in_specs=[
                    pl.BlockSpec((tm, dP), lambda i: (i, 0)),   # x row tile
                    pl.BlockSpec((dP, hP), lambda i: (0, 0)),   # W1 (resident)
                    pl.BlockSpec((1, hP), lambda i: (0, 0)),    # b1 (resident)
                    pl.BlockSpec((hP, dP), lambda i: (0, 0)),   # W2 (resident)
                    pl.BlockSpec((1, dP), lambda i: (0, 0)),    # b2 (resident)
                    pl.BlockSpec((tm, 1), lambda i: (i, 0)),    # mask row tile
                ],
                out_specs=pl.BlockSpec((tm, dP), lambda i: (i, 0)),
            ),
            compiler_params=cparams,
            cost_estimate=cost,
        )(x2, w1p, b1p, w2p, b2p, m2)
    else:
        out = pl.pallas_call(
            ffn_ktiled_kernel,
            out_shape=jax.ShapeDtypeStruct((Mp, dP), out_dtype),
            grid_spec=pltpu.PrefetchScalarGridSpec(
                num_scalar_prefetch=0,
                grid=(n_row_tiles, hP // tk),          # reduction axis LAST
                in_specs=[
                    pl.BlockSpec((tm, dP), lambda i, k: (i, 0)),  # x row tile
                    pl.BlockSpec((dP, tk), lambda i, k: (0, k)),  # W1 hidden slice
                    pl.BlockSpec((1, tk), lambda i, k: (0, k)),   # b1 hidden slice
                    pl.BlockSpec((tk, dP), lambda i, k: (k, 0)),  # W2 hidden slice
                    pl.BlockSpec((1, dP), lambda i, k: (0, 0)),   # b2
                    pl.BlockSpec((tm, 1), lambda i, k: (i, 0)),   # mask row tile
                ],
                out_specs=pl.BlockSpec((tm, dP), lambda i, k: (i, 0)),
                scratch_shapes=[pltpu.VMEM((tm, dP), jnp.float32)],
            ),
            compiler_params=cparams,
            cost_estimate=cost,
        )(x2, w1p, b1p, w2p, b2p, m2)

    if (Mp, dP) != (M, d_model):
        out = out[:M, :d_model]
    return out.reshape(B, S, d_model)


def xavier_normal(key, fan_in, fan_out, dtype=jnp.float32):
    # torch.nn.init.xavier_normal_: std = sqrt(2 / (fan_in + fan_out))
    std = (2.0 / (fan_in + fan_out)) ** 0.5
    return (std * jax.random.normal(key, (fan_in, fan_out))).astype(dtype)


if __name__ == "__main__":
    # Small shapes consistent with the module's forward.
    B, S, d_model, d_hid = 2, 8, 32, 32

    key = jax.random.PRNGKey(0)
    kx, km, k1, k2 = jax.random.split(key, 4)

    x = jax.random.normal(kx, (B, S, d_model), dtype=jnp.float32)
    # Binary mask broadcasting over the feature dim (like a padding mask).
    mas = (jax.random.uniform(km, (B, S, 1)) > 0.3).astype(jnp.float32)

    # Deterministic parameter init matching FFN.reset_parameters():
    # xavier_normal_ weights, zero biases. Stored as (in, out) = torch weight.T.
    w1 = xavier_normal(k1, d_model, d_hid)
    b1 = jnp.zeros((d_hid,), jnp.float32)
    w2 = xavier_normal(k2, d_hid, d_model)
    b2 = jnp.zeros((d_model,), jnp.float32)

    # Pure-JAX reference.
    ref = (jnp.maximum(x @ w1 + b1, 0.0) @ w2 + b2) * mas

    # f32 path (exact).
    out = jax.block_until_ready(ffn_pallas(x, mas, w1, b1, w2, b2))
    assert out.shape == (B, S, d_model)
    assert jnp.allclose(out, ref, atol=1e-5, rtol=1e-5)

    # bf16 MXU path (f32 accumulation) -- loose tolerance vs f32 reference.
    out_bf16 = jax.block_until_ready(
        ffn_pallas(x, mas, w1, b1, w2, b2, compute_dtype=jnp.bfloat16))
    assert out_bf16.shape == (B, S, d_model)
    assert jnp.allclose(out_bf16, ref, atol=0.25, rtol=0.1)

    print("KERNEL_OK")
</pallas_src>

<mosaic_0001>
module attributes {stable_mosaic.version = 11 : i64} {
  func.func @ffn_resident_kernel(%arg0: i32, %arg1: memref<8x128xf32, #tpu.memory_space<vmem>>, %arg2: memref<128x128xf32, #tpu.memory_space<vmem>>, %arg3: memref<1x128xf32, #tpu.memory_space<vmem>>, %arg4: memref<128x128xf32, #tpu.memory_space<vmem>>, %arg5: memref<1x128xf32, #tpu.memory_space<vmem>>, %arg6: memref<8x1xf32, #tpu.memory_space<vmem>>, %arg7: memref<8x128xf32, #tpu.memory_space<vmem>>) attributes {dimension_semantics = [#tpu.dimension_semantics<parallel>], iteration_bounds = array<i64: 2>, scalar_prefetch = 0 : i64, scratch_operands = 0 : i64, tpu.core_type = #tpu.core_type<tc>, window_params = [{transform_indices = @transform_0, window_bounds = array<i64: 8, 128>}, {pipeline_mode = #tpu.pipeline_mode<synchronous>, transform_indices = @transform_1, window_bounds = array<i64: 128, 128>}, {pipeline_mode = #tpu.pipeline_mode<synchronous>, transform_indices = @transform_2, window_bounds = array<i64: 1, 128>}, {pipeline_mode = #tpu.pipeline_mode<synchronous>, transform_indices = @transform_3, window_bounds = array<i64: 128, 128>}, {pipeline_mode = #tpu.pipeline_mode<synchronous>, transform_indices = @transform_4, window_bounds = array<i64: 1, 128>}, {transform_indices = @transform_5, window_bounds = array<i64: 8, 1>}, {transform_indices = @transform_6, window_bounds = array<i64: 8, 128>}]} {
    %c0 = arith.constant 0 : index
    %c0_0 = arith.constant 0 : index
    %0 = vector.load %arg1[%c0, %c0_0] : memref<8x128xf32, #tpu.memory_space<vmem>>, vector<8x128xf32>
    %c0_1 = arith.constant 0 : index
    %c0_2 = arith.constant 0 : index
    %1 = vector.load %arg2[%c0_1, %c0_2] : memref<128x128xf32, #tpu.memory_space<vmem>>, vector<128x128xf32>
    %cst = arith.constant dense<0.000000e+00> : vector<8x128xf32>
    %2 = tpu.matmul %0, %1, %cst {dimension_numbers = #tpu.dot_dimension_numbers<[1], [0], [0], [1], [0, 0, 1, 1], [], []>} : vector<8x128xf32>, vector<128x128xf32>, vector<8x128xf32> -> vector<8x128xf32>
    %c0_3 = arith.constant 0 : index
    %c0_4 = arith.constant 0 : index
    %3 = vector.load %arg3[%c0_3, %c0_4] : memref<1x128xf32, #tpu.memory_space<vmem>>, vector<1x128xf32>
    %4 = vector.broadcast %3 : vector<1x128xf32> to vector<8x128xf32>
    %5 = arith.addf %2, %4 : vector<8x128xf32>
    %cst_5 = arith.constant 0.000000e+00 : f32
    %6 = vector.broadcast %cst_5 : f32 to vector<8x128xf32>
    %7 = arith.maximumf %5, %6 : vector<8x128xf32>
    %c0_6 = arith.constant 0 : index
    %c0_7 = arith.constant 0 : index
    %8 = vector.load %arg4[%c0_6, %c0_7] : memref<128x128xf32, #tpu.memory_space<vmem>>, vector<128x128xf32>
    %cst_8 = arith.constant dense<0.000000e+00> : vector<8x128xf32>
    %9 = tpu.matmul %7, %8, %cst_8 {dimension_numbers = #tpu.dot_dimension_numbers<[1], [0], [0], [1], [0, 0, 1, 1], [], []>} : vector<8x128xf32>, vector<128x128xf32>, vector<8x128xf32> -> vector<8x128xf32>
    %c0_9 = arith.constant 0 : index
    %c0_10 = arith.constant 0 : index
    %10 = vector.load %arg5[%c0_9, %c0_10] : memref<1x128xf32, #tpu.memory_space<vmem>>, vector<1x128xf32>
    %11 = vector.broadcast %10 : vector<1x128xf32> to vector<8x128xf32>
    %12 = arith.addf %9, %11 : vector<8x128xf32>
    %c0_11 = arith.constant 0 : index
    %c0_12 = arith.constant 0 : index
    %13 = vector.load %arg6[%c0_11, %c0_12] : memref<8x1xf32, #tpu.memory_space<vmem>>, vector<8x1xf32>
    %14 = vector.broadcast %13 : vector<8x1xf32> to vector<8x128xf32>
    %15 = arith.mulf %12, %14 : vector<8x128xf32>
    %c0_13 = arith.constant 0 : index
    %c0_14 = arith.constant 0 : index
    %16 = vector.load %arg7[%c0_13, %c0_14] : memref<8x128xf32, #tpu.memory_space<vmem>>, vector<8x128xf32>
    tpu.vector_store %arg7[%c0_13, %c0_14], %15 {strides = array<i32>} : memref<8x128xf32, #tpu.memory_space<vmem>>, vector<8x128xf32>,
    return
  }
  func.func @transform_0(%arg0: i32) -> (i32, i32) {
    %c0_i32 = arith.constant 0 : i32
    %c0_i32_0 = arith.constant 0 : i32
    return %arg0, %c0_i32 : i32, i32
  }
  func.func @transform_1(%arg0: i32) -> (i32, i32) {
    %c0_i32 = arith.constant 0 : i32
    %c0_i32_0 = arith.constant 0 : i32
    %c0_i32_1 = arith.constant 0 : i32
    return %c0_i32, %c0_i32_0 : i32, i32
  }
  func.func @transform_2(%arg0: i32) -> (i32, i32) {
    %c0_i32 = arith.constant 0 : i32
    %c0_i32_0 = arith.constant 0 : i32
    %c0_i32_1 = arith.constant 0 : i32
    return %c0_i32, %c0_i32_0 : i32, i32
  }
  func.func @transform_3(%arg0: i32) -> (i32, i32) {
    %c0_i32 = arith.constant 0 : i32
    %c0_i32_0 = arith.constant 0 : i32
    %c0_i32_1 = arith.constant 0 : i32
    return %c0_i32, %c0_i32_0 : i32, i32
  }
  func.func @transform_4(%arg0: i32) -> (i32, i32) {
    %c0_i32 = arith.constant 0 : i32
    %c0_i32_0 = arith.constant 0 : i32
    %c0_i32_1 = arith.constant 0 : i32
    return %c0_i32, %c0_i32_0 : i32, i32
  }
  func.func @transform_5(%arg0: i32) -> (i32, i32) {
    %c0_i32 = arith.constant 0 : i32
    %c0_i32_0 = arith.constant 0 : i32
    return %arg0, %c0_i32 : i32, i32
  }
  func.func @transform_6(%arg0: i32) -> (i32, i32) {
    %c0_i32 = arith.constant 0 : i32
    %c0_i32_0 = arith.constant 0 : i32
    return %arg0, %c0_i32 : i32, i32
  }
}

</mosaic_0001>

<bundles_post_ra>
// kernel: tpu_custom_call.1
= control target key start
LH: loop header
LB: loop body
LE: loop exit
PB: predicated region body
PF: predicated region fallthrough
CT: control target
= control target key end

     0   :  { %11 = vsyncpa [#allocation3], 0  ;;  %s1205_s0 = inlined_call_operand.vmem [shape: f32[16,128], index: 0, kind: input, shape index: {}]   ;;  %s1206_s1 = inlined_call_operand.hbm [shape: f32[128,128], index: 1, kind: input, shape index: {}]   ;;  %s1207_s2 = inlined_call_operand.vmem [shape: f32[1,128], index: 2, kind: input, shape index: {}]   ;;  %s1208_s3 = inlined_call_operand.hbm [shape: f32[128,128], index: 3, kind: input, shape index: {}]   ;;  %s1209_s4 = inlined_call_operand.vmem [shape: f32[1,128], index: 4, kind: input, shape index: {}]   ;;  %s1210_s5 = inlined_call_operand.vmem [shape: f32[16,1], index: 5, kind: input, shape index: {}]   ;;  %s1211_s6 = inlined_call_operand.hbm [shape: f32[16,128], index: 6, kind: output, shape index: {}]  }
   0x1   :  { %12 = vsyncpa [#allocation6], 0 }
   0x2   :  { %13 = vsyncpa [#allocation4], 0 }
   0x3   :  { %15 = vsyncpa [#allocation4 + $0x1], 0  ;;  %s1005_s21 = smov 0   ;;  %s1007_s22 = smov 0  }
   0x4   :  { %s1009_s23 = smov 0   ;;  %s1011_s24 = smov 0  }
   0x5 LB: > { %s1026_s25 = sadd.s32 4294967295, %s959_s24   ;;  %s597_s26 = sadd.s32 4294967294, %s959_s24   ;;  %s959_s24 = sphi %s1011_s24, %s1229_s24   ;;  %s955_s23 = sphi %s1009_s23, %s1228_s23   ;;  %s951_s22 = sphi %s1007_s22, %s1227_s22   ;;  %s947_s21 = sphi %s1005_s21, %s1226_s21  }
   0x6   : > { %s1030_s27 = sadd.s32 1, %s959_s24   ;;  %s164_s28 = sadd.s32 1, %s955_s23 }
   0x7   : > { %s161_s29 = ssub.s32 %s959_s24, %s1030_s27  ;;  %p174_p0 = scmp.ne.s32.totalorder %s955_s23, %s951_s22 }
   0x8   : > { %p162_p1 = scmp.eq.s32.totalorder %s161_s29, 0  ;;  %p175_p2 = scmp.eq.s32.totalorder %s1026_s25, 1 }
   0x9   : > { %p180_p3 = scmp.ne.s32.totalorder %s951_s22, %s947_s21  ;;  %p181_p4 = scmp.eq.s32.totalorder %s597_s26, 1 }
   0xa   : > { %s1041_s30 = scalar_select %p162_p1, %s955_s23, %s164_s28  }
   0xb   : > { %p1043_p5 = por %p175_p2, %p174_p0  ;;  %p1047_p6 = por %p181_p4, %p180_p3 }
   0xc   : > { %p598_p7 = scmp.ge.s32.totalorder %s959_s24, 1  ;;  %p188_p8 = scmp.lt.s32.totalorder %s959_s24, 3 }
   0xd   : > { %s1215_s7 = scalar_select %p1043_p5, 1, 0 }
   0xe   : > { %s1216_s8 = scalar_select %p1047_p6, 1, 0 }
   0xf   : > { %p1212_p9 = scmp.eq.s32.totalorder %s1026_s25, 0  ;;  %p1054_p10 = pnand %p598_p7, %p188_p8 }
  0x10   : > { %s961_s10 = smov [#allocation2]   ;;  %s962_s13 = smov [#allocation5]  }
  0x11   : > { %s1217_s9 = scalar_select %p1054_p10, 1, 0 }
  0x12   : > { %s200_s11 = sshll.u32 %s961_s10, 4  ;;  %p776_p11 = pneg %p1054_p10  ;;  %s201_s11 = int_to_ptr.vmem [resolvable:$true] %s200_s11 }
  0x13   : > { %s216_s14 = sshll.u32 %s962_s13, 4  ;;  %s833_s17 = scalar_lea.hbm %s1206_s1, 2048  ;;  %s1066_s14 = int_to_ptr.vmem [resolvable:$true] %s216_s14 }
  0x14   : > { %p1062_p12 = pnand %p1212_p9, %p776_p11  ;;  %p834_p13 = scmp.ne.s32.totalorder %s1206_s1, %s833_s17 }
  0x15   : > { %p840_p3 = scmp.lt.u32.totalorder %s833_s17, %s1206_s1 }
  0x16   : > { %p835_p0 = pneg %p1062_p12 }
  0x18   : > { %p836_p1 = pnand %p835_p0, %p834_p13 }
  0x1a   : > { %p837_p2 = pneg %p836_p1 }
  0x1c   : > { %p842_p4 = pnand %p840_p3, %p837_p2 }
  0x1e   : > { %845 = shalt.err (!%p842_p4)
}
  0x1f   : > { %s846_s28 = scalar_lea.vmem %s201_s11, 2048  ;;  %p854_p9 = scmp.lt.s32.totalorder %s201_s11, %s201_s11 }
  0x20   : > { %p847_p7 = scmp.ne.s32.totalorder %s201_s11, %s846_s28  ;;  %p855_p6 = scmp.lt.s32.totalorder %s846_s28, %s846_s28 }
  0x22   : > { %p849_p8 = pnand %p847_p7, %p835_p0  ;;  %p856_p5 = por %p855_p6, %p854_p9 }
  0x24   : > { %p850_p11 = pneg %p849_p8 }
  0x26   : > { %p857_p10 = pnand %p856_p5, %p850_p11 }
  0x28   : > { %860 = shalt.err (!%p857_p10)
}
  0x29   : > { %s963_s29 = smov 128   ;;  %s964_s10 = smov 8  }
  0x2a   : > { %779 = dma.hbm_to_vmem [thread:$0]  (!%p1062_p12), %s1206_s1, 2048, %s201_s11, [#allocation3], %s963_s29, %s963_s29, %s964_s10  }
  0x2b   : > { %s861_s18 = scalar_lea.hbm %s1208_s3, 2048 }
  0x2c   : > { %p862_p13 = scmp.ne.s32.totalorder %s1208_s3, %s861_s18  ;;  %p868_p9 = scmp.lt.u32.totalorder %s861_s18, %s1208_s3 }
  0x2e   : > { %p864_p5 = pnand %p862_p13, %p835_p0 }
  0x30   : > { %p865_p6 = pneg %p864_p5 }
  0x32   : > { %p870_p10 = pnand %p868_p9, %p865_p6 }
  0x34   : > { %873 = shalt.err (!%p870_p10)
}
  0x35   : > { %s874_s11 = scalar_lea.vmem %s1066_s14, 2048  ;;  %p882_p4 = scmp.lt.s32.totalorder %s1066_s14, %s1066_s14 }
  0x36   : > { %p875_p1 = scmp.ne.s32.totalorder %s1066_s14, %s874_s11  ;;  %p883_p7 = scmp.lt.s32.totalorder %s874_s11, %s874_s11 }
  0x38   : > { %p877_p2 = pnand %p875_p1, %p835_p0  ;;  %p884_p8 = por %p883_p7, %p882_p4 }
  0x3a   : > { %p878_p3 = pneg %p877_p2 }
  0x3c   : > { %p885_p11 = pnand %p884_p8, %p878_p3 }
  0x3e   : > { %888 = shalt.err (!%p885_p11)
}
  0x3f   : > { %782 = dma.hbm_to_vmem [thread:$0]  (!%p1062_p12), %s1208_s3, 2048, %s1066_s14, [#allocation6], %s963_s29, %s963_s29, %s964_s10  }
  0x40   : > { %p1219_p13 = scmp.ne.s32.totalorder %s1217_s9, 0 }
  0x41   : > { %p1220_p5 = scmp.eq.s32.totalorder (!%p1219_p13), %s1026_s25, 0 }
  0x42   : > { %249 = sbr.rel (%p1219_p13) target bundleno = 559 (0x22f), region = 44 }
  0x49   : > { %934 = dma.done.wait (%p1220_p5), [#allocation3], 2048   ;;  %p1221_p0 = pmov %p1220_p5 }
  0x4b   : > { %936 = vsyncadd (%p1221_p0), [#allocation3], 4294965248  ;;  %p1222_p6 = pmov %p1221_p0 }
  0x4c   : > { %p1223_p9 = pmov %p1221_p0 }
  0x4d   : > { %938 = dma.done.wait (%p1222_p6), [#allocation6], 2048  }
  0x4e   : > { %940 = vsyncadd (%p1223_p9), [#allocation6], 4294965248  ;;  %v965_v0 = vmov 0.0|0.0   ;;  %vm966_vm0 = vmmov 0   ;;  %v967_v1 = vmov 0.0   ;;  %v295_v2 = vld [vmem:[#allocation2] sm:$0xff] }
  0x4f   : > { %718 = vmatprep.subr.bf16.mxu0 %v965_v0  ;;  %680 = vmatprep.mubr.msk.f32.mxu0 %vm966_vm0, %v967_v1  ;;  %v296_v3 = vld [vmem:[#allocation2 + $0x8] sm:$0xff]  ;;  %v297_v4 = vld [vmem:[#allocation2 + $0x10] sm:$0xff]  ;;  %v298_v6 = vld [vmem:[#allocation2 + $0x18] sm:$0xff]  ;;  %p286_p12 = scmp.lt.s32.totalorder %s1026_s25, 1  ;;  %v968_v51 = vmov 0   ;;  %s283_s26 = sand.u32 1, %s951_s22  }
  0x50   : > { %742 = vmatprep.subr.bf16.mxu1 %v965_v0  ;;  %715 = vmatprep.mubr.msk.f32.mxu1 %vm966_vm0, %v967_v1  ;;  %v719_v5 = vpack.c.bf16 %v296_v3, %v295_v2  ;;  %v722_v7 = vpack.c.bf16 %v298_v6, %v297_v4  ;;  %v299_v8 = vld [vmem:[#allocation2 + $0x20] sm:$0xff]  ;;  %v300_v9 = vld [vmem:[#allocation2 + $0x28] sm:$0xff]  ;;  %v391_v12 = vld [vmem:[#allocation5 + $0x10] sm:$0xff]  ;;  %s605_s28 = sshll.u32 %s283_s26, 3  ;;  %s611_s15 = sshll.u32 %s1026_s25, 7 }
  0x51   : > { %v389_v10 = vld [vmem:[#allocation5] sm:$0xff]  ;;  %v390_v11 = vld [vmem:[#allocation5 + $0x8] sm:$0xff]  ;;  %v392_v13 = vld [vmem:[#allocation5 + $0x18] sm:$0xff]  ;;  %v725_v14 = vpack.c.bf16 %v300_v9, %v299_v8  ;;  %s1137_s9 = scalar_select %p286_p12, %s1026_s25, 1  ;;  %832 = vset.pattern.permute.xlu0 %v968_v51 }
  0x52   : > { %720 = vmatpush3.bf16.msra.mxu0 %v719_v5  ;;  %v743_v15 = vpack.c.bf16 %v390_v11, %v389_v10  ;;  %v301_v16 = vld [vmem:[#allocation2 + $0x30] sm:$0xff]  ;;  %v302_v17 = vld [vmem:[#allocation2 + $0x38] sm:$0xff]  ;;  %v746_v18 = vpack.c.bf16 %v392_v13, %v391_v12  ;;  %v393_v19 = vld [vmem:[#allocation5 + $0x20] sm:$0xff]  ;;  %s491_s16 = scalar_lea.sflag [#allocation4], %s283_s26  ;;  %p1224_p1 = scmp.ne.s32.totalorder %s1215_s7, 0 }
  0x53   : > { %721 = vmatprep.subr.bf16.mxu0 %v965_v0  ;;  %v394_v20 = vld [vmem:[#allocation5 + $0x28] sm:$0xff]  ;;  %v728_v21 = vpack.c.bf16 %v302_v17, %v301_v16  ;;  %v303_v22 = vld [vmem:[#allocation2 + $0x40] sm:$0xff]  ;;  %v395_v25 = vld [vmem:[#allocation5 + $0x30] sm:$0xff]  ;;  %s606_s12 = sshll.u32 %s1137_s9, 3  ;;  %s285_s9 = scalar_lea.vmem [#allocation7], %s605_s28 }
  0x54   : > { %744 = vmatpush3.bf16.msra.mxu1 %v743_v15  ;;  %v304_v23 = vld [vmem:[#allocation2 + $0x48] sm:$0xff]  ;;  %v749_v24 = vpack.c.bf16 %v394_v20, %v393_v19  ;;  %v396_v26 = vld [vmem:[#allocation5 + $0x38] sm:$0xff]  ;;  %v305_v28 = vld [vmem:[#allocation2 + $0x50] sm:$0xff]  ;;  %s289_s10 = scalar_lea.vmem %s1205_s0, %s606_s12  ;;  %s293_s18 = scalar_lea.vmem %s1210_s5, %s606_s12 }
  0x55   : > { %745 = vmatprep.subr.bf16.mxu1 %v965_v0  ;;  %v731_v27 = vpack.c.bf16 %v304_v23, %v303_v22  ;;  %v306_v29 = vld [vmem:[#allocation2 + $0x58] sm:$0xff]  ;;  %v752_v30 = vpack.c.bf16 %v396_v26, %v395_v25  ;;  %v397_v31 = vld [vmem:[#allocation5 + $0x40] sm:$0xff]  ;;  %v398_v32 = vld [vmem:[#allocation5 + $0x48] sm:$0xff]  ;;  %s504_s12 = sshll.u32 %s285_s9, 4  ;;  %s969_s25 = smov [#allocation7]   ;;  %s1165_s12 = int_to_ptr.vmem [resolvable:$true] %s504_s12 }
  0x56   : > { %723 = vmatpush3.bf16.msra.mxu0 %v722_v7  ;;  %v734_v33 = vpack.c.bf16 %v306_v29, %v305_v28  ;;  %v307_v34 = vld [vmem:[#allocation2 + $0x60] sm:$0xff]  ;;  %v308_v35 = vld [vmem:[#allocation2 + $0x68] sm:$0xff]  ;;  %v755_v36 = vpack.c.bf16 %v398_v32, %v397_v31  ;;  %v399_v37 = vld [vmem:[#allocation5 + $0x50] sm:$0xff]  ;;  %s889_s17 = scalar_lea.vmem %s1165_s12, 128 }
  0x57   : > { %724 = vmatprep.subr.bf16.mxu0 %v965_v0  ;;  %v400_v38 = vld [vmem:[#allocation5 + $0x58] sm:$0xff]  ;;  %v737_v39 = vpack.c.bf16 %v308_v35, %v307_v34  ;;  %v309_v40 = vld [vmem:[#allocation2 + $0x70] sm:$0xff]  ;;  %v401_v43 = vld [vmem:[#allocation5 + $0x60] sm:$0xff]  ;;  %p890_p10 = scmp.ne.s32.totalorder %s1165_s12, %s889_s17 }
  0x58   : > { %747 = vmatpush3.bf16.msra.mxu1 %v746_v18  ;;  %v310_v41 = vld [vmem:[#allocation2 + $0x78] sm:$0xff]  ;;  %v758_v42 = vpack.c.bf16 %v400_v38, %v399_v37  ;;  %v402_v44 = vld [vmem:[#allocation5 + $0x68] sm:$0xff]  ;;  %v294_v47 = vld [vmem:[%s289_s10] sm:$0xff]  ;;  %s1163_s10 = scalar_lea.hbm %s1211_s6, %s611_s15 }
  0x59   : > { %748 = vmatprep.subr.bf16.mxu1 %v965_v0  ;;  %v740_v45 = vpack.c.bf16 %v310_v41, %v309_v40  ;;  %v761_v46 = vpack.c.bf16 %v402_v44, %v401_v43  ;;  %v403_v48 = vld [vmem:[#allocation5 + $0x70] sm:$0xff]  ;;  %v404_v49 = vld [vmem:[#allocation5 + $0x78] sm:$0xff]  ;;  %v482_v52 = vld [vmem:[%s293_s18] sm:$0xff]  ;;  %p891_p2 = pnand %p890_p10, %p1224_p1  ;;  %s893_s18 = sshll.u32 %s969_s25, 4  ;;  %s894_s18 = int_to_ptr.vmem [resolvable:$false] %s893_s18 }
  0x5a   : > { %726 = vmatpush3.bf16.msra.mxu0 %v725_v14  ;;  %v764_v50 = vpack.c.bf16 %v404_v49, %v403_v48  ;;  %485 = vperm.xlu0 %832, %v482_v52   ;;  %v608_v53 = vld [vmem:[%s1207_s2] ss:$0 sm:$0xff]  ;;  %s895_s19 = scalar_lea.vmem %s894_s18, 256  ;;  %p896_p4 = scmp.lt.s32.totalorder %s1165_s12, %s894_s18 }
  0x5b   : > { %727 = vmatprep.subr.bf16.mxu0 %v965_v0  ;;  %v609_v58 = vld [vmem:[%s1209_s4] ss:$0 sm:$0xff]  ;;  %p892_p3 = pneg %p891_p2  ;;  %p897_p7 = scmp.lt.s32.totalorder %s895_s19, %s889_s17 }
  0x5c   : > { %750 = vmatpush3.bf16.msra.mxu1 %v749_v24 }
  0x5d   : > { %751 = vmatprep.subr.bf16.mxu1 %v965_v0  ;;  %p898_p8 = por %p897_p7, %p896_p4 }
  0x5e   : > { %729 = vmatpush3.bf16.msra.mxu0 %v728_v21 }
  0x5f   : > { %730 = vmatprep.subr.bf16.mxu0 %v965_v0  ;;  %p899_p11 = pnand %p898_p8, %p892_p3 }
  0x60   : > { %753 = vmatpush3.bf16.msra.mxu1 %v752_v30 }
  0x61   : > { %754 = vmatprep.subr.bf16.mxu1 %v965_v0 }
  0x62   : > { %732 = vmatpush3.bf16.msra.mxu0 %v731_v27 }
  0x63   : > { %733 = vmatprep.subr.bf16.mxu0 %v965_v0 }
  0x64   : > { %756 = vmatpush3.bf16.msra.mxu1 %v755_v36 }
  0x65   : > { %757 = vmatprep.subr.bf16.mxu1 %v965_v0 }
  0x66   : > { %735 = vmatpush3.bf16.msra.mxu0 %v734_v33 }
  0x67   : > { %736 = vmatprep.subr.bf16.mxu0 %v965_v0 }
  0x68   : > { %759 = vmatpush3.bf16.msra.mxu1 %v758_v42 }
  0x69   : > { %760 = vmatprep.subr.bf16.mxu1 %v965_v0 }
  0x6a   : > { %738 = vmatpush3.bf16.msra.mxu0 %v737_v39 }
  0x6b   : > { %739 = vmatprep.subr.bf16.mxu0 %v965_v0 }
  0x6c   : > { %762 = vmatpush3.bf16.msra.mxu1 %v761_v46 }
  0x6d   : > { %763 = vmatprep.subr.bf16.mxu1 %v965_v0 }
  0x6e   : > { %741 = vmatpush3.bf16.msra.mxu0 %v740_v45 }
  0x70   : > { %765 = vmatpush3.bf16.msra.mxu1 %v764_v50 }
  0x71   : > { %681 = vmatmul.mubr.f32.vlgmr.msra.gmra.mrb[0].mxu0 %v294_v47 }
  0xd9   : > { %v486_v60 = vpop.permute.xlu0 %485 }
 0x144   : > { %v384_v54 = vpop.f32.mrb[0].mxu0 }
 0x145   : > { %v385_v55 = vadd.f32 %v608_v53, %v384_v54  ;;  %v682_v56 = vpop.f32.mrb[1].mxu0 }
 0x147   : > { %v388_v57 = vmax.f32 %v385_v55, 0.0 }
 0x149   : > { %716 = vmatmul.mubr.f32.vlgmr.msra.gmra.mrb[0].mxu1 %v388_v57 }
 0x21c   : > { %v478_v59 = vpop.f32.mrb[0].mxu1 }
 0x21d   : > { %v479_v61 = vadd.f32 %v609_v58, %v478_v59  ;;  %v717_v62 = vpop.f32.mrb[1].mxu1 }
 0x21f   : > { %v488_v63 = vmul.f32 %v486_v60, %v479_v61 }
 0x221   : > { %489 = vst [vmem:[%s285_s9] sm:$0xff] %v488_v63 }
 0x222   : > { %902 = shalt.err (!%p899_p11)
}
 0x223   : > { %s903_s20 = scalar_lea.hbm %s1163_s10, 128  ;;  %s907_s11 = scalar_lea.hbm %s1211_s6, 256 }
 0x224   : > { %p904_p13 = scmp.ne.s32.totalorder %s1163_s10, %s903_s20  ;;  %p908_p6 = scmp.lt.u32.totalorder %s1163_s10, %s1211_s6 }
 0x225   : > { %p909_p9 = scmp.lt.u32.totalorder %s907_s11, %s903_s20  ;;  %p911_p10 = scmp.lt.u32.totalorder %s903_s20, %s1163_s10 }
 0x226   : > { %p905_p5 = pnand %p904_p13, %p1224_p1 }
 0x227   : > { %p910_p12 = por %p909_p9, %p908_p6 }
 0x228   : > { %p906_p0 = pneg %p905_p5 }
 0x229   : > { %p912_p2 = por %p911_p10, %p910_p12 }
 0x22b   : > { %p913_p3 = pnand %p912_p2, %p906_p0 }
 0x22d   : > { %916 = shalt.err (!%p913_p3)
}
 0x22e   : > { %774 = dma.vmem_to_hbm [thread:$0]  (%p1224_p1), %s1165_s12, 128, %s1163_s10, %s491_s16  }
 0x22f PF: > { %p791_p4 = scmp.ge.s32.totalorder %s959_s24, 2  ;;  %s516_s9 = sand.u32 1, %s947_s21  }
 0x230   : > { %p1225_p7 = scmp.ne.s32.totalorder %s1216_s8, 0  ;;  %s517_s14 = scalar_lea.sflag [#allocation4], %s516_s9 }
 0x232   : > { %p784_p8 = pnand %p791_p4, %p1225_p7 }
 0x234   : > { %942 = dma.done.wait (!%p784_p8), %s517_s14, 128  }
 0x235   : > { %944 = vsyncadd (!%p784_p8), %s517_s14, 4294967168  ;;  %p18_p11 = scmp.ge.s32.totalorder %s1030_s27, 4   ;;  %s1226_s21 = smov %s951_s22 }
 0x236   : > { %s1227_s22 = smov %s955_s23  ;;  %s1228_s23 = smov %s1041_s30 }
 0x237   : > { %s1229_s24 = smov %s1030_s27  ;;  %20 = sbr.rel (!%p18_p11) target bundleno = 5 (0x5), region = 91 }
 0x23e   :  { %522 = vsyncpa [#allocation3], 1 }
 0x23f   :  { %524 = vsyncpa [#allocation3 + $0x1], 1 }
 0x240   :  { %525 = vsyncpa [#allocation6], 1 }
 0x241   :  { %526 = vsyncpa [#allocation4], 1 }
 0x242   :  { %528 = vsyncpa [#allocation4 + $0x1], 1 }

</bundles_post_ra>
